<compile_context>
chip_gen: v7x
topology: tpu7x:2x2x1
jax: 0.10.0
libtpu: 0.0.40
codegen_flags: <defaults>
</compile_context>

<pallas_src>
import functools

import jax
import jax.numpy as jnp
from jax import lax
from jax.experimental import pallas as pl
from jax.experimental.pallas import tpu as pltpu


# Rows of the packed (8, Hp) per-channel parameter block.
_BIAS, _GAMMA, _BETA, _RP_MOVE1, _RP_W, _RP_MOVE2, _LS_ALPHA, _LS_MOVE = range(8)


def _round_up(x, m):
    return ((x + m - 1) // m) * m


def _vit_output_kernel(x_ref, w_ref, par_ref, o_ref, *, hidden, hp, eps):
    """One row tile of the fused ViTOutput forward.

    x_ref   : (tile_rows, I)   input activations (intermediate-sized)
    w_ref   : (I, 2*Hp)        [dense weight | avg-pool matrix], padded cols zero
    par_ref : (8, Hp)          packed per-channel parameters (bias already holds move@W)
    o_ref   : (tile_rows, Hp)  output tile
    """
    x = x_ref[...].astype(jnp.float32)

    # One MXU contraction produces both the dense projection and the pooled branch.
    y_all = jnp.dot(x, w_ref[...], preferred_element_type=jnp.float32)
    y = y_all[:, :hp] + par_ref[_BIAS:_BIAS + 1, :]     # dense(x + move) + b
    pooled = y_all[:, hp:]                              # AvgPool1d(I // H)(x)

    # LayerNorm over the true `hidden` channels.  Padded columns of y are exactly
    # zero (zero weight columns + zero bias), so lane-wide sums equal sums over the
    # true channels; divide by `hidden`, not the padded lane width.
    inv_h = 1.0 / hidden
    mean = jnp.sum(y, axis=-1, keepdims=True) * inv_h
    mean_sq = jnp.sum(y * y, axis=-1, keepdims=True) * inv_h
    var = jnp.maximum(mean_sq - mean * mean, 0.0)
    inv = lax.rsqrt(var + eps)
    ln = (y - mean) * inv * par_ref[_GAMMA:_GAMMA + 1, :] + par_ref[_BETA:_BETA + 1, :]

    out = ln + pooled

    # RPReLU: out = PReLU_per_channel(out - move1) + move2.
    v = out - par_ref[_RP_MOVE1:_RP_MOVE1 + 1, :]
    v = jnp.maximum(v, 0.0) + par_ref[_RP_W:_RP_W + 1, :] * jnp.minimum(v, 0.0)
    out = v + par_ref[_RP_MOVE2:_RP_MOVE2 + 1, :]

    # LayerScale.
    out = out * par_ref[_LS_ALPHA:_LS_ALPHA + 1, :] + par_ref[_LS_MOVE:_LS_MOVE + 1, :]

    o_ref[...] = out.astype(o_ref.dtype)


def vit_output_forward(hidden_states, w, b, move, gamma, beta,
                       rp_move1, rp_weight, rp_move2, ls_alpha, ls_move,
                       *, eps=1e-6, tile_rows=256):
    """Fused BHViT ViTOutput forward.

    hidden_states: (..., I) with I = intermediate_size
    w: (I, H) dense weight (y = x @ w + b), b: (H,)
    move: (I,) pre-dense shift; gamma/beta: (H,) LayerNorm affine
    rp_move1/rp_weight/rp_move2: (H,) RPReLU params
    ls_alpha/ls_move: (H,) LayerScale params
    """
    orig_shape = hidden_states.shape
    inter = orig_shape[-1]
    hidden = w.shape[1]
    assert w.shape == (inter, hidden)
    assert inter % hidden == 0, "AvgPool1d kernel = intermediate // hidden"
    pool_k = inter // hidden

    x2d = hidden_states.reshape(-1, inter)
    rows = x2d.shape[0]

    # ---- lane-dense output: pad hidden channels up to a multiple of 128 ----
    hp = _round_up(hidden, 128)
    pad_h = hp - hidden

    def _pad_vec(v):
        return jnp.pad(v.astype(jnp.float32), (0, pad_h))

    w_f32 = w.astype(jnp.float32)
    move_f32 = move.astype(jnp.float32)

    # Fold the pre-dense shift into the bias:  (x + move) @ W + b == x @ W + bias_eff.
    bias_eff = b.astype(jnp.float32) + move_f32 @ w_f32           # (H,)

    w_p = jnp.pad(w_f32, ((0, 0), (0, pad_h)))                    # (I, Hp)

    # AvgPool1d(kernel=pool_k, stride=pool_k) as an (I, Hp) averaging matrix.
    win = jnp.arange(inter) // pool_k
    pool_mat = (win[:, None] == jnp.arange(hp)[None, :]).astype(jnp.float32) / pool_k

    # Augmented weight: one MXU contraction per tile feeds both branches.
    w_aug = jnp.concatenate([w_p, pool_mat], axis=1)              # (I, 2*Hp)

    params = jnp.stack([
        _pad_vec(bias_eff),   # _BIAS  (already includes move @ W)
        _pad_vec(gamma),      # _GAMMA
        _pad_vec(beta),       # _BETA
        _pad_vec(rp_move1),   # _RP_MOVE1
        _pad_vec(rp_weight),  # _RP_W
        _pad_vec(rp_move2),   # _RP_MOVE2
        _pad_vec(ls_alpha),   # _LS_ALPHA
        _pad_vec(ls_move),    # _LS_MOVE
    ])                        # (8, Hp)

    # ---- row tiling: always a proper multi-block grid, rows padded to the tile ----
    tile = max(8, min(int(tile_rows), _round_up(rows, 8)))
    tile = _round_up(tile, 8)
    rows_p = _round_up(rows, tile)
    if rows_p != rows:
        x2d = jnp.pad(x2d, ((0, rows_p - rows), (0, 0)))
    grid = (rows_p // tile,)

    kernel = functools.partial(_vit_output_kernel, hidden=hidden, hp=hp, eps=eps)

    out2d = pl.pallas_call(
        kernel,
        out_shape=jax.ShapeDtypeStruct((rows_p, hp), hidden_states.dtype),
        grid_spec=pltpu.PrefetchScalarGridSpec(
            num_scalar_prefetch=0,
            grid=grid,
            in_specs=[
                pl.BlockSpec((tile, inter), lambda i: (i, 0)),     # x row tile
                pl.BlockSpec((inter, 2 * hp), lambda i: (0, 0)),   # [W | pool] (resident)
                pl.BlockSpec((8, hp), lambda i: (0, 0)),           # packed channel params
            ],
            out_specs=pl.BlockSpec((tile, hp), lambda i: (i, 0)),
        ),
        compiler_params=pltpu.CompilerParams(
            dimension_semantics=("parallel",),   # shard row tiles across TCs
            vmem_limit_bytes=48 * 1024 * 1024,   # double-buffered tiles + resident W_aug
        ),
    )(x2d, w_aug, params)

    out = out2d[:rows, :hidden]
    return out.reshape(orig_shape[:-1] + (hidden,))


def _reference(x, w, b, move, gamma, beta,
               rp_move1, rp_weight, rp_move2, ls_alpha, ls_move, *, eps):
    inter = x.shape[-1]
    hidden = w.shape[1]
    pool_k = inter // hidden
    y = (x + move) @ w + b
    mean = jnp.mean(y, axis=-1, keepdims=True)
    var = jnp.mean((y - mean) ** 2, axis=-1, keepdims=True)
    ln = (y - mean) / jnp.sqrt(var + eps) * gamma + beta
    pooled = x.reshape(x.shape[:-1] + (hidden, pool_k)).mean(-1)
    out = ln + pooled
    v = out - rp_move1
    v = jnp.where(v > 0, v, rp_weight * v)
    out = v + rp_move2
    return out * ls_alpha + ls_move


if __name__ == "__main__":
    batch, seq, hidden, inter = 2, 8, 32, 128   # intermediate = 4 * hidden
    eps = 1e-6

    key = jax.random.PRNGKey(0)
    keys = jax.random.split(key, 11)
    x = jax.random.normal(keys[0], (batch, seq, inter), dtype=jnp.float32)

    # PyTorch default inits would be: move/b/beta/rp_move*/ls_move zeros, gamma ones,
    # PReLU weight 0.25, alpha 0.1.  Small random perturbations are used so every
    # term of the fused epilogue is actually exercised by the correctness check.
    w = jax.random.normal(keys[1], (inter, hidden), jnp.float32) / jnp.sqrt(1.0 * inter)
    b = jax.random.normal(keys[2], (hidden,), jnp.float32) * 0.1
    move = jax.random.normal(keys[3], (inter,), jnp.float32) * 0.1
    gamma = 1.0 + jax.random.normal(keys[4], (hidden,), jnp.float32) * 0.1
    beta = jax.random.normal(keys[5], (hidden,), jnp.float32) * 0.1
    rp_move1 = jax.random.normal(keys[6], (hidden,), jnp.float32) * 0.1
    rp_weight = 0.25 + jax.random.normal(keys[7], (hidden,), jnp.float32) * 0.05
    rp_move2 = jax.random.normal(keys[8], (hidden,), jnp.float32) * 0.1
    ls_alpha = 0.1 + jax.random.normal(keys[9], (hidden,), jnp.float32) * 0.01
    ls_move = jax.random.normal(keys[10], (hidden,), jnp.float32) * 0.1

    out = vit_output_forward(x, w, b, move, gamma, beta,
                             rp_move1, rp_weight, rp_move2, ls_alpha, ls_move,
                             eps=eps)
    out = jax.block_until_ready(out)

    ref = _reference(x, w, b, move, gamma, beta,
                     rp_move1, rp_weight, rp_move2, ls_alpha, ls_move, eps=eps)

    assert out.shape == (batch, seq, hidden) and out.dtype == x.dtype
    max_err = float(jnp.max(jnp.abs(out - ref)))
    assert jnp.allclose(out, ref, atol=5e-3, rtol=5e-3), max_err
    print("KERNEL_OK")
</pallas_src>

<mosaic_0001>
module attributes {stable_mosaic.version = 11 : i64} {
  func.func @_vit_output_kernel(%arg0: i32, %arg1: memref<16x128xf32, #tpu.memory_space<vmem>>, %arg2: memref<128x256xf32, #tpu.memory_space<vmem>>, %arg3: memref<8x128xf32, #tpu.memory_space<vmem>>, %arg4: memref<16x128xf32, #tpu.memory_space<vmem>>) attributes {dimension_semantics = [#tpu.dimension_semantics<parallel>], iteration_bounds = array<i64: 1>, scalar_prefetch = 0 : i64, scratch_operands = 0 : i64, tpu.core_type = #tpu.core_type<tc>, window_params = [{transform_indices = @transform_0, window_bounds = array<i64: 16, 128>}, {pipeline_mode = #tpu.pipeline_mode<synchronous>, transform_indices = @transform_1, window_bounds = array<i64: 128, 256>}, {pipeline_mode = #tpu.pipeline_mode<synchronous>, transform_indices = @transform_2, window_bounds = array<i64: 8, 128>}, {transform_indices = @transform_3, window_bounds = array<i64: 16, 128>}]} {
    %c0 = arith.constant 0 : index
    %c0_0 = arith.constant 0 : index
    %0 = vector.load %arg1[%c0, %c0_0] : memref<16x128xf32, #tpu.memory_space<vmem>>, vector<16x128xf32>
    %c0_1 = arith.constant 0 : index
    %c0_2 = arith.constant 0 : index
    %1 = vector.load %arg2[%c0_1, %c0_2] : memref<128x256xf32, #tpu.memory_space<vmem>>, vector<128x256xf32>
    %cst = arith.constant dense<0.000000e+00> : vector<16x256xf32>
    %2 = tpu.matmul %0, %1, %cst {dimension_numbers = #tpu.dot_dimension_numbers<[1], [0], [0], [1], [0, 0, 1, 1], [], []>} : vector<16x128xf32>, vector<128x256xf32>, vector<16x256xf32> -> vector<16x256xf32>
    %3 = vector.extract_strided_slice %2 {offsets = [0, 0], sizes = [16, 128], strides = [1, 1]} : vector<16x256xf32> to vector<16x128xf32>
    %c0_3 = arith.constant 0 : index
    %c0_4 = arith.constant 0 : index
    %4 = vector.load %arg3[%c0_3, %c0_4] : memref<8x128xf32, #tpu.memory_space<vmem>>, vector<1x128xf32>
    %5 = vector.broadcast %4 : vector<1x128xf32> to vector<16x128xf32>
    %6 = arith.addf %3, %5 : vector<16x128xf32>
    %7 = vector.extract_strided_slice %2 {offsets = [0, 128], sizes = [16, 128], strides = [1, 1]} : vector<16x256xf32> to vector<16x128xf32>
    %cst_5 = arith.constant dense<0.000000e+00> : vector<16xf32>
    %8 = vector.multi_reduction <add>, %6, %cst_5 [1] : vector<16x128xf32> to vector<16xf32>
    %9 = vector.shape_cast %8 : vector<16xf32> to vector<16x1xf32>
    %cst_6 = arith.constant 3.125000e-02 : f32
    %10 = vector.broadcast %cst_6 : f32 to vector<16x1xf32>
    %11 = arith.mulf %9, %10 : vector<16x1xf32>
    %12 = arith.mulf %6, %6 : vector<16x128xf32>
    %cst_7 = arith.constant dense<0.000000e+00> : vector<16xf32>
    %13 = vector.multi_reduction <add>, %12, %cst_7 [1] : vector<16x128xf32> to vector<16xf32>
    %14 = vector.shape_cast %13 : vector<16xf32> to vector<16x1xf32>
    %cst_8 = arith.constant 3.125000e-02 : f32
    %15 = vector.broadcast %cst_8 : f32 to vector<16x1xf32>
    %16 = arith.mulf %14, %15 : vector<16x1xf32>
    %17 = arith.mulf %11, %11 : vector<16x1xf32>
    %18 = arith.subf %16, %17 : vector<16x1xf32>
    %cst_9 = arith.constant 0.000000e+00 : f32
    %19 = vector.broadcast %cst_9 : f32 to vector<16x1xf32>
    %20 = arith.maximumf %18, %19 : vector<16x1xf32>
    %cst_10 = arith.constant 9.99999997E-7 : f32
    %21 = vector.broadcast %cst_10 : f32 to vector<16x1xf32>
    %22 = arith.addf %20, %21 : vector<16x1xf32>
    %23 = math.rsqrt %22 : vector<16x1xf32>
    %24 = vector.broadcast %11 : vector<16x1xf32> to vector<16x128xf32>
    %25 = arith.subf %6, %24 : vector<16x128xf32>
    %26 = vector.broadcast %23 : vector<16x1xf32> to vector<16x128xf32>
    %27 = arith.mulf %25, %26 : vector<16x128xf32>
    %c1 = arith.constant 1 : index
    %c0_11 = arith.constant 0 : index
    %28 = vector.load %arg3[%c1, %c0_11] : memref<8x128xf32, #tpu.memory_space<vmem>>, vector<1x128xf32>
    %29 = vector.broadcast %28 : vector<1x128xf32> to vector<16x128xf32>
    %30 = arith.mulf %27, %29 : vector<16x128xf32>
    %c2 = arith.constant 2 : index
    %c0_12 = arith.constant 0 : index
    %31 = vector.load %arg3[%c2, %c0_12] : memref<8x128xf32, #tpu.memory_space<vmem>>, vector<1x128xf32>
    %32 = vector.broadcast %31 : vector<1x128xf32> to vector<16x128xf32>
    %33 = arith.addf %30, %32 : vector<16x128xf32>
    %34 = arith.addf %33, %7 : vector<16x128xf32>
    %c3 = arith.constant 3 : index
    %c0_13 = arith.constant 0 : index
    %35 = vector.load %arg3[%c3, %c0_13] : memref<8x128xf32, #tpu.memory_space<vmem>>, vector<1x128xf32>
    %36 = vector.broadcast %35 : vector<1x128xf32> to vector<16x128xf32>
    %37 = arith.subf %34, %36 : vector<16x128xf32>
    %cst_14 = arith.constant 0.000000e+00 : f32
    %38 = vector.broadcast %cst_14 : f32 to vector<16x128xf32>
    %39 = arith.maximumf %37, %38 : vector<16x128xf32>
    %c4 = arith.constant 4 : index
    %c0_15 = arith.constant 0 : index
    %40 = vector.load %arg3[%c4, %c0_15] : memref<8x128xf32, #tpu.memory_space<vmem>>, vector<1x128xf32>
    %cst_16 = arith.constant 0.000000e+00 : f32
    %41 = vector.broadcast %cst_16 : f32 to vector<16x128xf32>
    %42 = arith.minimumf %37, %41 : vector<16x128xf32>
    %43 = vector.broadcast %40 : vector<1x128xf32> to vector<16x128xf32>
    %44 = arith.mulf %43, %42 : vector<16x128xf32>
    %45 = arith.addf %39, %44 : vector<16x128xf32>
    %c5 = arith.constant 5 : index
    %c0_17 = arith.constant 0 : index
    %46 = vector.load %arg3[%c5, %c0_17] : memref<8x128xf32, #tpu.memory_space<vmem>>, vector<1x128xf32>
    %47 = vector.broadcast %46 : vector<1x128xf32> to vector<16x128xf32>
    %48 = arith.addf %45, %47 : vector<16x128xf32>
    %c6 = arith.constant 6 : index
    %c0_18 = arith.constant 0 : index
    %49 = vector.load %arg3[%c6, %c0_18] : memref<8x128xf32, #tpu.memory_space<vmem>>, vector<1x128xf32>
    %50 = vector.broadcast %49 : vector<1x128xf32> to vector<16x128xf32>
    %51 = arith.mulf %48, %50 : vector<16x128xf32>
    %c7 = arith.constant 7 : index
    %c0_19 = arith.constant 0 : index
    %52 = vector.load %arg3[%c7, %c0_19] : memref<8x128xf32, #tpu.memory_space<vmem>>, vector<1x128xf32>
    %53 = vector.broadcast %52 : vector<1x128xf32> to vector<16x128xf32>
    %54 = arith.addf %51, %53 : vector<16x128xf32>
    %c0_20 = arith.constant 0 : index
    %c0_21 = arith.constant 0 : index
    %55 = vector.load %arg4[%c0_20, %c0_21] : memref<16x128xf32, #tpu.memory_space<vmem>>, vector<16x128xf32>
    tpu.vector_store %arg4[%c0_20, %c0_21], %54 {strides = array<i32>} : memref<16x128xf32, #tpu.memory_space<vmem>>, vector<16x128xf32>,
    return
  }
  func.func @transform_0(%arg0: i32) -> (i32, i32) {
    %c0_i32 = arith.constant 0 : i32
    %c0_i32_0 = arith.constant 0 : i32
    return %arg0, %c0_i32 : i32, i32
  }
  func.func @transform_1(%arg0: i32) -> (i32, i32) {
    %c0_i32 = arith.constant 0 : i32
    %c0_i32_0 = arith.constant 0 : i32
    %c0_i32_1 = arith.constant 0 : i32
    return %c0_i32, %c0_i32_0 : i32, i32
  }
  func.func @transform_2(%arg0: i32) -> (i32, i32) {
    %c0_i32 = arith.constant 0 : i32
    %c0_i32_0 = arith.constant 0 : i32
    %c0_i32_1 = arith.constant 0 : i32
    return %c0_i32, %c0_i32_0 : i32, i32
  }
  func.func @transform_3(%arg0: i32) -> (i32, i32) {
    %c0_i32 = arith.constant 0 : i32
    %c0_i32_0 = arith.constant 0 : i32
    return %arg0, %c0_i32 : i32, i32
  }
}

</mosaic_0001>

<bundles_post_ra>
// kernel: tpu_custom_call.1
= control target key start
LH: loop header
LB: loop body
LE: loop exit
PB: predicated region body
PF: predicated region fallthrough
CT: control target
= control target key end

     0   :  { %8 = vsyncpa [#allocation3], 0  ;;  %s523_s0 = inlined_call_operand.hbm [shape: f32[16,128], index: 0, kind: input, shape index: {}]   ;;  %s524_s1 = inlined_call_operand.hbm [shape: f32[128,256], index: 1, kind: input, shape index: {}]   ;;  %s525_s2 = inlined_call_operand.hbm [shape: f32[8,128], index: 2, kind: input, shape index: {}]   ;;  %s526_s3 = inlined_call_operand.hbm [shape: f32[16,128], index: 3, kind: output, shape index: {}]  }
   0x1   :  { %9 = vsyncpa [#allocation6], 0 }
   0x2   :  { %10 = vsyncpa [#allocation4], 0  ;;  %s440_s12 = smov [#allocation5]   ;;  %s346_s16 = scalar_lea.hbm %s524_s1, 4096 }
   0x3   :  { %s28_s13 = sshll.u32 %s440_s12, 4  ;;  %p347_p0 = scmp.ne.s32.totalorder %s524_s1, %s346_s16  ;;  %s29_s13 = int_to_ptr.vmem [resolvable:$true] %s28_s13 }
   0x4   :  { %p350_p1 = scmp.lt.u32.totalorder %s346_s16, %s524_s1 }
   0x6   :  { %p352_p2 = pnand %p350_p1, %p347_p0 }
   0x8   :  { %355 = shalt.err (!%p352_p2)
}
   0x9   :  { %s356_s21 = scalar_lea.vmem %s29_s13, 4096  ;;  %p361_p4 = scmp.lt.s32.totalorder %s29_s13, %s29_s13 }
   0xa   :  { %p357_p3 = scmp.ne.s32.totalorder %s29_s13, %s356_s21  ;;  %p362_p5 = scmp.lt.s32.totalorder %s356_s21, %s356_s21 }
   0xc   :  { %p363_p6 = por %p362_p5, %p361_p4 }
   0xe   :  { %p364_p7 = pnand %p363_p6, %p357_p3 }
  0x10   :  { %367 = shalt.err (!%p364_p7)
}
  0x11   :  { %s441_s22 = smov 256   ;;  %s442_s23 = smov 16  }
  0x12   :  { %34 = dma.hbm_to_vmem [thread:$0]  %s524_s1, 4096, %s29_s13, [#allocation6], %s441_s22, %s441_s22, %s442_s23  }
  0x13   :  { %s443_s26 = smov [#allocation2]   ;;  %s368_s30 = scalar_lea.hbm %s523_s0, 256 }
  0x14   :  { %s16_s27 = sshll.u32 %s443_s26, 4  ;;  %p369_p8 = scmp.ne.s32.totalorder %s523_s0, %s368_s30  ;;  %s17_s27 = int_to_ptr.vmem [resolvable:$true] %s16_s27 }
  0x15   :  { %p372_p9 = scmp.lt.u32.totalorder %s368_s30, %s523_s0 }
  0x17   :  { %p374_p10 = pnand %p372_p9, %p369_p8 }
  0x19   :  { %377 = shalt.err (!%p374_p10)
}
  0x1a   :  { %s378_s8 = scalar_lea.vmem %s17_s27, 256  ;;  %p383_p12 = scmp.lt.s32.totalorder %s17_s27, %s17_s27 }
  0x1b   :  { %p379_p11 = scmp.ne.s32.totalorder %s17_s27, %s378_s8  ;;  %p384_p13 = scmp.lt.s32.totalorder %s378_s8, %s378_s8 }
  0x1d   :  { %p385_p0 = por %p384_p13, %p383_p12 }
  0x1f   :  { %p386_p1 = pnand %p385_p0, %p379_p11 }
  0x21   :  { %389 = shalt.err (!%p386_p1)
}
  0x22   :  { %s444_s1 = smov 128   ;;  %s445_s9 = smov 8  }
  0x23   :  { %22 = dma.hbm_to_vmem [thread:$0]  %s523_s0, 256, %s17_s27, [#allocation3], %s444_s1, %s444_s1, %s445_s9  }
  0x24   :  { %s446_s12 = smov [#allocation7]   ;;  %s390_s16 = scalar_lea.hbm %s525_s2, 128 }
  0x25   :  { %s41_s13 = sshll.u32 %s446_s12, 4  ;;  %p391_p2 = scmp.ne.s32.totalorder %s525_s2, %s390_s16  ;;  %s42_s13 = int_to_ptr.vmem [resolvable:$true] %s41_s13 }
  0x26   :  { %p394_p3 = scmp.lt.u32.totalorder %s390_s16, %s525_s2 }
  0x28   :  { %p396_p4 = pnand %p394_p3, %p391_p2 }
  0x2a   :  { %399 = shalt.err (!%p396_p4)
}
  0x2b   :  { %s400_s21 = scalar_lea.vmem %s42_s13, 128  ;;  %p405_p6 = scmp.lt.s32.totalorder %s42_s13, %s42_s13 }
  0x2c   :  { %p401_p5 = scmp.ne.s32.totalorder %s42_s13, %s400_s21  ;;  %p406_p7 = scmp.lt.s32.totalorder %s400_s21, %s400_s21 }
  0x2e   :  { %p407_p8 = por %p406_p7, %p405_p6 }
  0x30   :  { %p408_p9 = pnand %p407_p8, %p401_p5 }
  0x32   :  { %411 = shalt.err (!%p408_p9)
}
  0x33   :  { %44 = dma.hbm_to_vmem [thread:$0]  %s525_s2, 128, %s42_s13, [#allocation6]  }
  0x34   :  { %434 = dma.done.wait [#allocation3], 256  }
  0x35   :  { %435 = vsyncadd [#allocation3], 4294967040 }
  0x36   :  { %436 = dma.done.wait [#allocation6], 4224  }
  0x37   :  { %437 = vsyncadd [#allocation6], 4294963072  ;;  %v447_v0 = vmov 0.0   ;;  %v57_v1 = vld [vmem:[#allocation5 + $0x8] sm:$0xff]  ;;  %v59_v2 = vld [vmem:[#allocation5 + $0x18] sm:$0xff]  ;;  %s448_s2 = smov [#allocation8]  }
  0x38   :  { %152 = vmatprep.mubr.f32.mxu0 %v447_v0  ;;  %158 = vmatprep.mubr.f32.mxu1 %v447_v0  ;;  %v56_v3 = vld [vmem:[#allocation5] sm:$0xff]  ;;  %v285_v4 = vpack.c.bf16 %v59_v2, %v57_v1  ;;  %v58_v5 = vld [vmem:[#allocation5 + $0x10] sm:$0xff]  ;;  %v61_v6 = vld [vmem:[#allocation5 + $0x28] sm:$0xff]  ;;  %s264_s23 = sshll.u32 %s448_s2, 4  ;;  %s265_s23 = int_to_ptr.vmem [resolvable:$true] %s264_s23 }
  0x39   :  { %v63_v7 = vld [vmem:[#allocation5 + $0x38] sm:$0xff]  ;;  %v287_v8 = vpack.c.bf16 %v58_v5, %v56_v3  ;;  %v60_v10 = vld [vmem:[#allocation5 + $0x20] sm:$0xff]  ;;  %v62_v11 = vld [vmem:[#allocation5 + $0x30] sm:$0xff]  ;;  %s412_s24 = scalar_lea.vmem %s265_s23, 256  ;;  %p417_p11 = scmp.lt.s32.totalorder %s265_s23, %s265_s23 }
  0x3a   :  { %v289_v9 = vpack.c.bf16 %v63_v7, %v61_v6  ;;  %v65_v12 = vld [vmem:[#allocation5 + $0x48] sm:$0xff]  ;;  %286 = vmatprep.subr.bf16.mxu0 %v285_v4  ;;  %317 = vmatprep.subr.bf16.mxu1 %v285_v4  ;;  %v67_v13 = vld [vmem:[#allocation5 + $0x58] sm:$0xff]  ;;  %v291_v14 = vpack.c.bf16 %v62_v11, %v60_v10  ;;  %v64_v16 = vld [vmem:[#allocation5 + $0x40] sm:$0xff]  ;;  %p413_p10 = scmp.ne.s32.totalorder %s265_s23, %s412_s24  ;;  %p418_p12 = scmp.lt.s32.totalorder %s412_s24, %s412_s24 }
  0x3b   :  { %288 = vmatpush1.bf16.msra.mxu0 %v287_v8  ;;  %325 = vmatpush1.bf16.msra.mxu1 %v287_v8  ;;  %v293_v15 = vpack.c.bf16 %v67_v13, %v65_v12  ;;  %v66_v17 = vld [vmem:[#allocation5 + $0x50] sm:$0xff]  ;;  %v69_v18 = vld [vmem:[#allocation5 + $0x68] sm:$0xff]  ;;  %v71_v19 = vld [vmem:[#allocation5 + $0x78] sm:$0xff] }
  0x3c   :  { %290 = vmatprep.subr.bf16.mxu0 %v289_v9  ;;  %318 = vmatprep.subr.bf16.mxu1 %v289_v9  ;;  %v295_v20 = vpack.c.bf16 %v66_v17, %v64_v16  ;;  %v297_v21 = vpack.c.bf16 %v71_v19, %v69_v18  ;;  %v68_v22 = vld [vmem:[#allocation5 + $0x60] sm:$0xff]  ;;  %v70_v23 = vld [vmem:[#allocation5 + $0x70] sm:$0xff]  ;;  %v73_v24 = vld [vmem:[#allocation5 + $0x88] sm:$0xff]  ;;  %p419_p13 = por %p418_p12, %p417_p11 }
  0x3d   :  { %v75_v25 = vld [vmem:[#allocation5 + $0x98] sm:$0xff]  ;;  %v299_v26 = vpack.c.bf16 %v70_v23, %v68_v22  ;;  %v72_v28 = vld [vmem:[#allocation5 + $0x80] sm:$0xff]  ;;  %v74_v29 = vld [vmem:[#allocation5 + $0x90] sm:$0xff] }
  0x3e   :  { %v301_v27 = vpack.c.bf16 %v75_v25, %v73_v24  ;;  %v77_v30 = vld [vmem:[#allocation5 + $0xa8] sm:$0xff]  ;;  %v79_v31 = vld [vmem:[#allocation5 + $0xb8] sm:$0xff]  ;;  %v303_v32 = vpack.c.bf16 %v74_v29, %v72_v28  ;;  %v76_v34 = vld [vmem:[#allocation5 + $0xa0] sm:$0xff]  ;;  %p420_p0 = pnand %p419_p13, %p413_p10 }
  0x3f   :  { %292 = vmatpush1.bf16.msra.mxu0 %v291_v14  ;;  %326 = vmatpush1.bf16.msra.mxu1 %v291_v14  ;;  %v305_v33 = vpack.c.bf16 %v79_v31, %v77_v30  ;;  %v78_v35 = vld [vmem:[#allocation5 + $0xb0] sm:$0xff]  ;;  %v81_v36 = vld [vmem:[#allocation5 + $0xc8] sm:$0xff]  ;;  %v83_v37 = vld [vmem:[#allocation5 + $0xd8] sm:$0xff] }
  0x40   :  { %294 = vmatprep.subr.bf16.mxu0 %v293_v15  ;;  %319 = vmatprep.subr.bf16.mxu1 %v293_v15  ;;  %v307_v38 = vpack.c.bf16 %v78_v35, %v76_v34  ;;  %v309_v39 = vpack.c.bf16 %v83_v37, %v81_v36  ;;  %v80_v40 = vld [vmem:[#allocation5 + $0xc0] sm:$0xff]  ;;  %v82_v41 = vld [vmem:[#allocation5 + $0xd0] sm:$0xff]  ;;  %v85_v42 = vld [vmem:[#allocation5 + $0xe8] sm:$0xff] }
  0x41   :  { %v87_v43 = vld [vmem:[#allocation5 + $0xf8] sm:$0xff]  ;;  %v311_v44 = vpack.c.bf16 %v82_v41, %v80_v40  ;;  %v84_v46 = vld [vmem:[#allocation5 + $0xe0] sm:$0xff]  ;;  %v86_v47 = vld [vmem:[#allocation5 + $0xf0] sm:$0xff] }
  0x42   :  { %v313_v45 = vpack.c.bf16 %v87_v43, %v85_v42  ;;  %v315_v48 = vpack.c.bf16 %v86_v47, %v84_v46  ;;  %v54_v49 = vld [vmem:[#allocation2] sm:$0xff]  ;;  %v55_v50 = vld [vmem:[#allocation2 + $0x8] sm:$0xff]  ;;  %v277_v51 = vld [vmem:[#allocation7] ss:$0 sm:$0xff] }
  0x43   :  { %296 = vmatpush1.bf16.msra.mxu0 %v295_v20  ;;  %327 = vmatpush1.bf16.msra.mxu1 %v295_v20  ;;  %v278_v14 = vld [vmem:[#allocation7 + $0x1] ss:$0 sm:$0xff]  ;;  %v279_v16 = vld [vmem:[#allocation7 + $0x2] ss:$0 sm:$0xff]  ;;  %v280_v22 = vld [vmem:[#allocation7 + $0x3] ss:$0 sm:$0xff] }
  0x44   :  { %298 = vmatprep.subr.bf16.mxu0 %v297_v21  ;;  %320 = vmatprep.subr.bf16.mxu1 %v297_v21  ;;  %v283_v36 = vld [vmem:[#allocation7 + $0x6] ss:$0 sm:$0xff]  ;;  %v284_v40 = vld [vmem:[#allocation7 + $0x7] ss:$0 sm:$0xff] }
  0x47   :  { %300 = vmatpush1.bf16.msra.mxu0 %v299_v26  ;;  %328 = vmatpush1.bf16.msra.mxu1 %v299_v26 }
  0x48   :  { %302 = vmatprep.subr.bf16.mxu0 %v301_v27  ;;  %321 = vmatprep.subr.bf16.mxu1 %v301_v27  ;;  %v281_v27 = vld [vmem:[#allocation7 + $0x4] ss:$0 sm:$0xff] }
  0x4b   :  { %304 = vmatpush1.bf16.msra.mxu0 %v303_v32  ;;  %329 = vmatpush1.bf16.msra.mxu1 %v303_v32 }
  0x4c   :  { %306 = vmatprep.subr.bf16.mxu0 %v305_v33  ;;  %322 = vmatprep.subr.bf16.mxu1 %v305_v33  ;;  %v282_v33 = vld [vmem:[#allocation7 + $0x5] ss:$0 sm:$0xff] }
  0x4f   :  { %308 = vmatpush1.bf16.msra.mxu0 %v307_v38  ;;  %330 = vmatpush1.bf16.msra.mxu1 %v307_v38 }
  0x50   :  { %310 = vmatprep.subr.bf16.mxu0 %v309_v39  ;;  %323 = vmatprep.subr.bf16.mxu1 %v309_v39 }
  0x53   :  { %312 = vmatpush1.bf16.msra.mxu0 %v311_v44  ;;  %331 = vmatpush1.bf16.msra.mxu1 %v311_v44 }
  0x54   :  { %314 = vmatprep.subr.bf16.mxu0 %v313_v45  ;;  %324 = vmatprep.subr.bf16.mxu1 %v313_v45 }
  0x57   :  { %316 = vmatpush1.bf16.msra.mxu0 %v315_v48  ;;  %332 = vmatpush1.bf16.msra.mxu1 %v315_v48 }
  0x5a   :  { %153 = vmatmul.mubr.f32.vlgmr.msra.gmra.mrb[0].mxu0 %v54_v49  ;;  %159 = vmatmul.mubr.f32.vlgmr.msra.gmra.mrb[0].mxu1 %v55_v50 }
 0x12d   :  { %v154_v52 = vpop.f32.mrb[0].mxu0  ;;  %v160_v53 = vpop.f32.mrb[0].mxu1 }
 0x12e   :  { %v170_v54 = vadd.f32 %v277_v51, %v154_v52  ;;  %v156_v55 = vpop.f32.mrb[1].mxu0  ;;  %v171_v56 = vadd.f32 %v277_v51, %v160_v53  ;;  %v162_v57 = vpop.f32.mrb[1].mxu1 }
 0x130   :  { %172 = vadd.xlane.f32.xlu0 %v170_v54  ;;  %v178_v58 = vmul.f32 %v170_v54, %v170_v54  ;;  %v179_v59 = vmul.f32 %v171_v56, %v171_v56 }
 0x132   :  { %180 = vadd.xlane.f32.xlu1 %v178_v58 }
 0x134   :  { %174 = vadd.xlane.f32.xlu0 %v171_v56 }
 0x136   :  { %182 = vadd.xlane.f32.xlu1 %v179_v59 }
 0x1bd   :  { %v173_v60 = vpop.xlane.xlu0 %172 }
 0x1be   :  { %v176_v61 = vmul.f32 0.03125, %v173_v60 }
 0x1bf   :  { %v181_v62 = vpop.xlane.xlu1 %180 }
 0x1c0   :  { %v186_v63 = vmul.f32 %v176_v61, %v176_v61  ;;  %v184_v0 = vmul.f32 0.03125, %v181_v62  ;;  %v196_v12 = vsub.f32 %v170_v54, %v176_v61 }
 0x1c1   :  { %v175_v1 = vpop.xlane.xlu0 %174 }
 0x1c2   :  { %v188_v2 = vsub.f32 %v184_v0, %v186_v63  ;;  %v177_v3 = vmul.f32 0.03125, %v175_v1 }
 0x1c3   :  { %v183_v4 = vpop.xlane.xlu1 %182 }
 0x1c4   :  { %v190_v5 = vmax.f32 %v188_v2, 0.0  ;;  %v187_v6 = vmul.f32 %v177_v3, %v177_v3  ;;  %v185_v7 = vmul.f32 0.03125, %v183_v4  ;;  %v197_v18 = vsub.f32 %v171_v56, %v177_v3 }
 0x1c6   :  { %v192_v8 = vadd.f32 1e-06, %v190_v5  ;;  %v189_v9 = vsub.f32 %v185_v7, %v187_v6 }
 0x1c8   :  { %342 = vrsqrt.f32 %v192_v8  ;;  %v191_v10 = vmax.f32 %v189_v9, 0.0 }
 0x1ca   :  { %v193_v11 = vadd.f32 1e-06, %v191_v10 }
 0x1cc   :  { %344 = vrsqrt.f32 %v193_v11 }
 0x1d2   :  { %v343_v13 = vpop.eup %342 }
 0x1d3   :  { %v198_v15 = vmul.f32 %v343_v13, %v196_v12 }
 0x1d5   :  { %v205_v17 = vmul.f32 %v278_v14, %v198_v15 }
 0x1d6   :  { %v345_v19 = vpop.eup %344 }
 0x1d7   :  { %v212_v20 = vadd.f32 %v279_v16, %v205_v17  ;;  %v199_v21 = vmul.f32 %v345_v19, %v197_v18 }
 0x1d9   :  { %v206_v23 = vmul.f32 %v278_v14, %v199_v21  ;;  %v214_v24 = vadd.f32 %v212_v20, %v156_v55 }
 0x1db   :  { %v213_v25 = vadd.f32 %v279_v16, %v206_v23  ;;  %v221_v26 = vsub.f32 %v214_v24, %v280_v22 }
 0x1dd   :  { %v215_v28 = vadd.f32 %v213_v25, %v162_v57  ;;  %v226_v29 = vmin.f32 %v221_v26, 0.0  ;;  %v223_v31 = vmax.f32 %v221_v26, 0.0 }
 0x1df   :  { %v222_v30 = vsub.f32 %v215_v28, %v280_v22  ;;  %v232_v32 = vmul.f32 %v281_v27, %v226_v29 }
 0x1e1   :  { %v227_v34 = vmin.f32 %v222_v30, 0.0  ;;  %v234_v35 = vadd.f32 %v232_v32, %v223_v31  ;;  %v224_v37 = vmax.f32 %v222_v30, 0.0 }
 0x1e3   :  { %v233_v38 = vmul.f32 %v281_v27, %v227_v34  ;;  %v241_v39 = vadd.f32 %v282_v33, %v234_v35 }
 0x1e5   :  { %v235_v41 = vadd.f32 %v233_v38, %v224_v37  ;;  %v248_v42 = vmul.f32 %v283_v36, %v241_v39 }
 0x1e7   :  { %v242_v43 = vadd.f32 %v282_v33, %v235_v41  ;;  %v255_v44 = vadd.f32 %v284_v40, %v248_v42 }
 0x1e9   :  { %v249_v45 = vmul.f32 %v283_v36, %v242_v43  ;;  %257 = vst [vmem:[#allocation8] sm:$0xff] %v255_v44 }
 0x1eb   :  { %v256_v46 = vadd.f32 %v284_v40, %v249_v45 }
 0x1ed   :  { %258 = vst [vmem:[#allocation8 + $0x8] sm:$0xff] %v256_v46 }
 0x1ee   :  { %423 = shalt.err (!%p420_p0)
}
 0x1ef   :  { %s424_s27 = scalar_lea.hbm %s526_s3, 256 }
 0x1f0   :  { %p425_p1 = scmp.ne.s32.totalorder %s526_s3, %s424_s27  ;;  %p428_p2 = scmp.lt.u32.totalorder %s424_s27, %s526_s3 }
 0x1f2   :  { %p430_p3 = pnand %p428_p2, %p425_p1 }
 0x1f4   :  { %433 = shalt.err (!%p430_p3)
}
 0x1f5   :  { %270 = dma.vmem_to_hbm [thread:$0]  %s265_s23, 256, %s526_s3, [#allocation4], %s444_s1, %s444_s1, %s445_s9  }
 0x1f6   :  { %438 = dma.done.wait [#allocation4], 256  }
 0x1f7   :  { %439 = vsyncadd [#allocation4], 4294967040 }
 0x1f8   :  { %274 = vsyncpa [#allocation3], 1 }
 0x1f9   :  { %275 = vsyncpa [#allocation6], 1 }
 0x1fa   :  { %276 = vsyncpa [#allocation4], 1 }

</bundles_post_ra>
